<compile_context>
chip_gen: v6e
topology: v6e:2x2x1
jax: 0.10.0
libtpu: 0.0.40
codegen_flags: <defaults>
</compile_context>

<pallas_src>
import jax
import jax.numpy as jnp
from jax.experimental import pallas as pl
from jax.experimental.pallas import tpu as pltpu


def _round_up(x, m):
    return (x + m - 1) // m * m


def _pick_tiles_and_vmem():
    """Generation-aware defaults: (tile_m, tile_h, vmem_limit_bytes).

    Per M tile the kernel streams the whole W_up + W_down (~45 MB bf16 at real
    Phi4MM shapes), so arithmetic intensity ~= tile_m FLOP/byte:
      * 128-MiB-VMEM parts (v5e/v6e): high ridge (v6e ~680 FLOP/B) -> tm=1024,
        scoped-VMEM limit 96 MiB (working set ~57 MiB + headroom).
      * 64-MiB-VMEM parts (v7x): ridge ~310 FLOP/B -> tm=512 already
        compute-bound, working set ~36 MiB, limit 48 MiB (< physical 64 MiB).
    """
    try:
        info = pltpu.get_tpu_info()
        vmem_bytes = getattr(info, "vmem_capacity_bytes", 64 * 1024 * 1024)
    except Exception:
        vmem_bytes = 64 * 1024 * 1024
    if vmem_bytes >= 100 * 1024 * 1024:
        return 1024, 512, 96 * 1024 * 1024
    return 512, 512, 48 * 1024 * 1024


def _pick_tm(M, tile_m):
    if M <= 256:
        # Tiny token counts: single tile; weight-stream-bound anyway.
        return _round_up(max(M, 1), 16)
    # Large M: MXU-friendly multiple of 256, and >= 2 M tiles when possible so
    # both v7x TensorCores get work on the (only) "parallel" grid axis.
    half = _round_up(pl.cdiv(M, 2), 256)
    return max(256, min(tile_m, half))


def _pick_th(hidden, tile_h):
    if hidden <= tile_h:
        return hidden
    # Prefer a lane-aligned th that divides hidden exactly -> no per-call
    # weight padding (which would rewrite ~45 MB of weights in HBM each call).
    for cand in range(_round_up(tile_h, 128), 127, -128):
        if hidden % cand == 0:
            return cand
    return _round_up(tile_h, 128)  # fallback: padding path


def _projector_kernel(x_ref, wu_ref, bu_ref, wd_ref, bd_ref, o_ref, acc_ref):
    j = pl.program_id(1)

    @pl.when(j == 0)
    def _init():
        acc_ref[...] = jnp.zeros_like(acc_ref)

    # Up projection on this hidden tile. wu_ref is a contiguous [th, in] row
    # slab of the PyTorch-layout up weight; contract the last dims of both
    # operands (transposed-RHS matmul on the MXU, f32 accumulation, no operand
    # upcasts).
    h = jax.lax.dot_general(
        x_ref[...], wu_ref[...],
        dimension_numbers=(((1,), (1,)), ((), ())),
        preferred_element_type=jnp.float32)
    h = h + bu_ref[...].astype(jnp.float32)

    # Exact (erf) GELU, f32 only on the (tm, th) activation tile.
    # Note: if profiling shows VALU co-saturating with the MXU once the kernel
    # is compute-bound (v6e/v7x), the tanh-approx GELU (EUP) is cheaper but
    # changes numerics vs nn.GELU().
    inv_sqrt2 = jnp.float32(0.7071067811865476)
    h = 0.5 * h * (1.0 + jax.lax.erf(h * inv_sqrt2))

    # Down projection: accumulate partial products over hidden tiles.
    acc_ref[...] += jnp.dot(h.astype(wd_ref.dtype), wd_ref[...],
                            preferred_element_type=jnp.float32)

    @pl.when(j == pl.num_programs(1) - 1)
    def _finalize():
        o_ref[...] = (acc_ref[...]
                      + bd_ref[...].astype(jnp.float32)).astype(o_ref.dtype)


def phi4mm_projector(x, w_up_t, b_up, w_down, b_down, *,
                     tile_m=None, tile_h=None, vmem_limit_bytes=None):
    """Fused projector: gelu(x @ w_up_t.T + b_up) @ w_down + b_down.

    Weight layouts (so every streamed weight tile is a contiguous HBM slab):
      x:       [..., input_size]
      w_up_t:  [hidden_size, input_size]   (== PyTorch nn.Linear up.weight)
      b_up:    [hidden_size]
      w_down:  [hidden_size, output_size]  (transpose of PyTorch down.weight;
                                            do this once at weight-load time)
      b_down:  [output_size]
    """
    d_tm, d_th, d_vmem = _pick_tiles_and_vmem()
    tile_m = d_tm if tile_m is None else tile_m
    tile_h = d_th if tile_h is None else tile_h
    vmem_limit_bytes = d_vmem if vmem_limit_bytes is None else vmem_limit_bytes

    orig_shape = x.shape
    in_size = orig_shape[-1]
    hidden = w_up_t.shape[0]
    out_size = w_down.shape[1]

    x2d = x.reshape(-1, in_size)
    M = x2d.shape[0]

    # --- M tiling: pad rows up to a multiple of tm.
    tm = _pick_tm(M, tile_m)
    M_pad = _round_up(M, tm)
    if M_pad != M:
        x2d = jnp.pad(x2d, ((0, M_pad - M), (0, 0)))

    # --- hidden tiling: th divides hidden whenever possible (no weight pad).
    th = _pick_th(hidden, tile_h)
    H_pad = _round_up(hidden, th)

    w_up_p = w_up_t
    b_up_p = b_up.reshape(1, hidden)
    w_down_p = w_down
    if H_pad != hidden:
        # Padded hidden columns give gelu(0)=0 activations hitting zero W_down
        # rows -> no contribution.
        # TODO(synk): if hidden has no lane-aligned divisor near tile_h,
        # pre-pad the weights once at load time instead of per call.
        w_up_p = jnp.pad(w_up_p, ((0, H_pad - hidden), (0, 0)))
        b_up_p = jnp.pad(b_up_p, ((0, 0), (0, H_pad - hidden)))
        w_down_p = jnp.pad(w_down_p, ((0, H_pad - hidden), (0, 0)))
    b_down_p = b_down.reshape(1, out_size)

    grid = (M_pad // tm, H_pad // th)

    out = pl.pallas_call(
        _projector_kernel,
        out_shape=jax.ShapeDtypeStruct((M_pad, out_size), x.dtype),
        grid_spec=pltpu.PrefetchScalarGridSpec(
            num_scalar_prefetch=0,
            grid=grid,
            in_specs=[
                pl.BlockSpec((tm, in_size), lambda i, j: (i, 0)),    # x rows
                pl.BlockSpec((th, in_size), lambda i, j: (j, 0)),    # W_up^T slab
                pl.BlockSpec((1, th), lambda i, j: (0, j)),          # b_up tile
                pl.BlockSpec((th, out_size), lambda i, j: (j, 0)),   # W_down slab
                pl.BlockSpec((1, out_size), lambda i, j: (0, 0)),    # b_down
            ],
            out_specs=pl.BlockSpec((tm, out_size), lambda i, j: (i, 0)),
            scratch_shapes=[pltpu.VMEM((tm, out_size), jnp.float32)],
        ),
        compiler_params=pltpu.CompilerParams(
            dimension_semantics=("parallel", "arbitrary"),
            vmem_limit_bytes=vmem_limit_bytes,
        ),
    )(x2d, w_up_p, b_up_p, w_down_p, b_down_p)

    out = out[:M]
    return out.reshape(*orig_shape[:-1], out_size)


def _reference(x, w_up_t, b_up, w_down, b_down):
    xf = x.astype(jnp.float32)
    h = jnp.dot(xf, w_up_t.astype(jnp.float32).T) + b_up.astype(jnp.float32)
    h = jax.nn.gelu(h, approximate=False)
    return jnp.dot(h, w_down.astype(jnp.float32)) + b_down.astype(jnp.float32)


if __name__ == "__main__":
    # Small shapes consistent with the module: batch=2, seq=8,
    # input_size=32, hidden_size=64.
    batch, seq = 2, 8
    input_size, hidden_size = 32, 64

    key = jax.random.PRNGKey(0)
    kx, ku, kbu, kd, kbd = jax.random.split(key, 5)

    x = jax.random.normal(kx, (batch, seq, input_size), dtype=jnp.float32)
    # Synthetic params. w_up_t is [hidden, in] (PyTorch nn.Linear layout);
    # w_down is [hidden_in, hidden_out] (pre-transposed once, as at load time).
    w_up_t = jax.random.normal(ku, (hidden_size, input_size), jnp.float32) * 0.05
    b_up = jax.random.normal(kbu, (hidden_size,), jnp.float32) * 0.01
    w_down = jax.random.normal(kd, (hidden_size, hidden_size), jnp.float32) * 0.05
    b_down = jax.random.normal(kbd, (hidden_size,), jnp.float32) * 0.01

    y_ref = _reference(x, w_up_t, b_up, w_down, b_down)

    # --- f32 path: tight tolerance.
    y = jax.block_until_ready(phi4mm_projector(x, w_up_t, b_up, w_down, b_down))
    assert y.shape == (batch, seq, hidden_size)
    assert jnp.allclose(y, y_ref.astype(y.dtype), atol=1e-4, rtol=1e-4), \
        "f32 mismatch vs reference"

    # --- bf16 path: expected mixed-precision deviation, looser tolerance.
    to_bf16 = lambda a: a.astype(jnp.bfloat16)
    y_bf16 = jax.block_until_ready(
        phi4mm_projector(to_bf16(x), to_bf16(w_up_t), to_bf16(b_up),
                         to_bf16(w_down), to_bf16(b_down)))
    assert y_bf16.dtype == jnp.bfloat16
    err = jnp.abs(y_bf16.astype(jnp.float32) - y_ref)
    assert bool(jnp.all(err <= 3e-2 + 5e-2 * jnp.abs(y_ref))), \
        "bf16 mismatch vs reference"

    print("KERNEL_OK")
</pallas_src>

<mosaic_0001>
module attributes {stable_mosaic.version = 11 : i64} {
  func.func @_projector_kernel(%arg0: i32, %arg1: i32, %arg2: memref<16x32xf32, #tpu.memory_space<vmem>>, %arg3: memref<64x32xf32, #tpu.memory_space<vmem>>, %arg4: memref<1x64xf32, #tpu.memory_space<vmem>>, %arg5: memref<64x64xf32, #tpu.memory_space<vmem>>, %arg6: memref<1x64xf32, #tpu.memory_space<vmem>>, %arg7: memref<16x64xf32, #tpu.memory_space<vmem>>, %arg8: memref<16x64xf32, #tpu.memory_space<vmem>>) attributes {dimension_semantics = [#tpu.dimension_semantics<parallel>, #tpu.dimension_semantics<arbitrary>], iteration_bounds = array<i64: 1, 1>, scalar_prefetch = 0 : i64, scratch_operands = 1 : i64, tpu.core_type = #tpu.core_type<tc>, window_params = [{transform_indices = @transform_0, window_bounds = array<i64: 16, 32>}, {transform_indices = @transform_1, window_bounds = array<i64: 64, 32>}, {transform_indices = @transform_2, window_bounds = array<i64: 1, 64>}, {transform_indices = @transform_3, window_bounds = array<i64: 64, 64>}, {pipeline_mode = #tpu.pipeline_mode<synchronous>, transform_indices = @transform_4, window_bounds = array<i64: 1, 64>}, {transform_indices = @transform_5, window_bounds = array<i64: 16, 64>}]} {
    %c0_i32 = arith.constant 0 : i32
    %0 = arith.cmpi eq, %arg1, %c0_i32 : i32
    %1 = arith.extui %0 : i1 to i32
    %c0_i32_0 = arith.constant 0 : i32
    %2 = arith.cmpi ne, %1, %c0_i32_0 : i32
    scf.if %2 {
      %cst_18 = arith.constant 0.000000e+00 : f32
      %25 = vector.broadcast %cst_18 : f32 to vector<16x64xf32>
      %c0_19 = arith.constant 0 : index
      %c0_20 = arith.constant 0 : index
      %26 = vector.load %arg8[%c0_19, %c0_20] : memref<16x64xf32, #tpu.memory_space<vmem>>, vector<16x64xf32>
      tpu.vector_store %arg8[%c0_19, %c0_20], %25 {strides = array<i32>} : memref<16x64xf32, #tpu.memory_space<vmem>>, vector<16x64xf32>,
    } else {
    }
    %c0 = arith.constant 0 : index
    %c0_1 = arith.constant 0 : index
    %3 = vector.load %arg2[%c0, %c0_1] : memref<16x32xf32, #tpu.memory_space<vmem>>, vector<16x32xf32>
    %c0_2 = arith.constant 0 : index
    %c0_3 = arith.constant 0 : index
    %4 = vector.load %arg3[%c0_2, %c0_3] : memref<64x32xf32, #tpu.memory_space<vmem>>, vector<64x32xf32>
    %cst = arith.constant dense<0.000000e+00> : vector<16x64xf32>
    %5 = tpu.matmul %3, %4, %cst {dimension_numbers = #tpu.dot_dimension_numbers<[1], [1], [0], [0], [0, 0, 1, 0], [], []>} : vector<16x32xf32>, vector<64x32xf32>, vector<16x64xf32> -> vector<16x64xf32>
    %c0_4 = arith.constant 0 : index
    %c0_5 = arith.constant 0 : index
    %6 = vector.load %arg4[%c0_4, %c0_5] : memref<1x64xf32, #tpu.memory_space<vmem>>, vector<1x64xf32>
    %7 = vector.broadcast %6 : vector<1x64xf32> to vector<16x64xf32>
    %8 = arith.addf %5, %7 : vector<16x64xf32>
    %cst_6 = arith.constant 5.000000e-01 : f32
    %9 = vector.broadcast %cst_6 : f32 to vector<16x64xf32>
    %10 = arith.mulf %9, %8 : vector<16x64xf32>
    %cst_7 = arith.constant 0.707106769 : f32
    %11 = vector.broadcast %cst_7 : f32 to vector<16x64xf32>
    %12 = arith.mulf %8, %11 : vector<16x64xf32>
    %13 = math.erf %12 : vector<16x64xf32>
    %cst_8 = arith.constant 1.000000e+00 : f32
    %14 = vector.broadcast %cst_8 : f32 to vector<16x64xf32>
    %15 = arith.addf %14, %13 : vector<16x64xf32>
    %16 = arith.mulf %10, %15 : vector<16x64xf32>
    %c0_9 = arith.constant 0 : index
    %c0_10 = arith.constant 0 : index
    %17 = vector.load %arg8[%c0_9, %c0_10] : memref<16x64xf32, #tpu.memory_space<vmem>>, vector<16x64xf32>
    %c0_11 = arith.constant 0 : index
    %c0_12 = arith.constant 0 : index
    %18 = vector.load %arg5[%c0_11, %c0_12] : memref<64x64xf32, #tpu.memory_space<vmem>>, vector<64x64xf32>
    %cst_13 = arith.constant dense<0.000000e+00> : vector<16x64xf32>
    %19 = tpu.matmul %16, %18, %cst_13 {dimension_numbers = #tpu.dot_dimension_numbers<[1], [0], [0], [1], [0, 0, 1, 1], [], []>} : vector<16x64xf32>, vector<64x64xf32>, vector<16x64xf32> -> vector<16x64xf32>
    %20 = arith.addf %17, %19 : vector<16x64xf32>
    %c0_14 = arith.constant 0 : index
    %c0_15 = arith.constant 0 : index
    %21 = vector.load %arg8[%c0_14, %c0_15] : memref<16x64xf32, #tpu.memory_space<vmem>>, vector<16x64xf32>
    tpu.vector_store %arg8[%c0_14, %c0_15], %20 {strides = array<i32>} : memref<16x64xf32, #tpu.memory_space<vmem>>, vector<16x64xf32>,
    %c0_i32_16 = arith.constant 0 : i32
    %22 = arith.cmpi eq, %arg1, %c0_i32_16 : i32
    %23 = arith.extui %22 : i1 to i32
    %c0_i32_17 = arith.constant 0 : i32
    %24 = arith.cmpi ne, %23, %c0_i32_17 : i32
    scf.if %24 {
      %c0_18 = arith.constant 0 : index
      %c0_19 = arith.constant 0 : index
      %25 = vector.load %arg8[%c0_18, %c0_19] : memref<16x64xf32, #tpu.memory_space<vmem>>, vector<16x64xf32>
      %c0_20 = arith.constant 0 : index
      %c0_21 = arith.constant 0 : index
      %26 = vector.load %arg6[%c0_20, %c0_21] : memref<1x64xf32, #tpu.memory_space<vmem>>, vector<1x64xf32>
      %27 = vector.broadcast %26 : vector<1x64xf32> to vector<16x64xf32>
      %28 = arith.addf %25, %27 : vector<16x64xf32>
      %c0_22 = arith.constant 0 : index
      %c0_23 = arith.constant 0 : index
      %29 = vector.load %arg7[%c0_22, %c0_23] : memref<16x64xf32, #tpu.memory_space<vmem>>, vector<16x64xf32>
      tpu.vector_store %arg7[%c0_22, %c0_23], %28 {strides = array<i32>} : memref<16x64xf32, #tpu.memory_space<vmem>>, vector<16x64xf32>,
    } else {
    }
    return
  }
  func.func @transform_0(%arg0: i32, %arg1: i32) -> (i32, i32) {
    %c0_i32 = arith.constant 0 : i32
    %c0_i32_0 = arith.constant 0 : i32
    return %arg0, %c0_i32 : i32, i32
  }
  func.func @transform_1(%arg0: i32, %arg1: i32) -> (i32, i32) {
    %c0_i32 = arith.constant 0 : i32
    %c0_i32_0 = arith.constant 0 : i32
    return %arg1, %c0_i32 : i32, i32
  }
  func.func @transform_2(%arg0: i32, %arg1: i32) -> (i32, i32) {
    %c0_i32 = arith.constant 0 : i32
    %c0_i32_0 = arith.constant 0 : i32
    return %c0_i32, %arg1 : i32, i32
  }
  func.func @transform_3(%arg0: i32, %arg1: i32) -> (i32, i32) {
    %c0_i32 = arith.constant 0 : i32
    %c0_i32_0 = arith.constant 0 : i32
    return %arg1, %c0_i32 : i32, i32
  }
  func.func @transform_4(%arg0: i32, %arg1: i32) -> (i32, i32) {
    %c0_i32 = arith.constant 0 : i32
    %c0_i32_0 = arith.constant 0 : i32
    %c0_i32_1 = arith.constant 0 : i32
    return %c0_i32, %c0_i32_0 : i32, i32
  }
  func.func @transform_5(%arg0: i32, %arg1: i32) -> (i32, i32) {
    %c0_i32 = arith.constant 0 : i32
    %c0_i32_0 = arith.constant 0 : i32
    return %arg0, %c0_i32 : i32, i32
  }
}

</mosaic_0001>

<bundles_post_ra>
// kernel: tpu_custom_call.1
= control target key start
LH: loop header
LB: loop body
LE: loop exit
PB: predicated region body
PF: predicated region fallthrough
CT: control target
= control target key end

     0   :  { %vm45_vm0 = vcmask 261120   ;;  %s514_s0 = inlined_call_operand.vmem [shape: f32[16,32], index: 0, kind: input, shape index: {}]   ;;  %s515_s1 = inlined_call_operand.vmem [shape: f32[64,32], index: 1, kind: input, shape index: {}]   ;;  %s516_s2 = inlined_call_operand.vmem [shape: f32[1,64], index: 2, kind: input, shape index: {}]   ;;  %s517_s3 = inlined_call_operand.vmem [shape: f32[64,64], index: 3, kind: input, shape index: {}]   ;;  %s518_s4 = inlined_call_operand.vmem [shape: f32[1,64], index: 4, kind: input, shape index: {}]   ;;  %s519_s5 = inlined_call_operand.hbm [shape: f32[16,64], index: 5, kind: output, shape index: {}]  }
   0x1   :  { %v37_v0 = vld [vmem:[%s515_s1 + $0x38] sm:$0xff]  ;;  %v36_v1 = vld [vmem:[%s515_s1 + $0x30] sm:$0xff]  ;;  %v28_v2 = vld [vmem:[%s514_s0] sm:$0xff] }
   0x2   :  { %323 = vmatprep.subr.msk.mxu0 %vm45_vm0, %v37_v0  ;;  %339 = vmatprep.mubr.msk.f32.mxu0 %vm45_vm0, %v28_v2 }
   0x3   :  { %324 = vmatpush3.xpose.msk.msra.mxu0 %vm45_vm0, %v37_v0 }
   0x4   :  { %325 = vmatprep.subr.msk.mxu0 %vm45_vm0, %v36_v1 }
   0x5   :  { %10 = vsyncpa [#allocation4], 0  ;;  %v35_v3 = vld [vmem:[%s515_s1 + $0x28] sm:$0xff]  ;;  %v34_v4 = vld [vmem:[%s515_s1 + $0x20] sm:$0xff]  ;;  %vm25_vm1 = vcmask 523264   ;;  %v391_v18 = vmov 0.0  }
   0x6   :  { %v33_v5 = vld [vmem:[%s515_s1 + $0x18] sm:$0xff]  ;;  %v32_v6 = vld [vmem:[%s515_s1 + $0x10] sm:$0xff]  ;;  %v31_v7 = vld [vmem:[%s515_s1 + $0x8] sm:$0xff]  ;;  %27 = vst.msk [vmem:[#allocation2 + $0x8] sm:$0xff] %vm25_vm1, %v391_v18  ;;  %s392_s29 = smov [#allocation3]  }
   0x7   :  { %326 = vmatpush3.xpose.msk.msra.mxu0 %vm45_vm0, %v36_v1  ;;  %v30_v8 = vld [vmem:[%s515_s1] sm:$0xff]  ;;  %v29_v9 = vld [vmem:[%s514_s0 + $0x8] sm:$0xff]  ;;  %v170_v10 = vld [vmem:[%s517_s3 + $0x38] sm:$0xff]  ;;  %26 = vst.msk [vmem:[#allocation2] sm:$0xff] %vm25_vm1, %v391_v18  ;;  %s278_s30 = sshll.u32 %s392_s29, 4  ;;  %s279_s30 = int_to_ptr.vmem [resolvable:$true] %s278_s30 }
   0x8   :  { %327 = vmatprep.subr.msk.mxu0 %vm45_vm0, %v35_v3  ;;  %342 = vmatprep.subr.mxu1 %v170_v10  ;;  %v169_v11 = vld [vmem:[%s517_s3 + $0x30] sm:$0xff]  ;;  %v168_v12 = vld [vmem:[%s517_s3 + $0x28] sm:$0xff]  ;;  %v167_v13 = vld [vmem:[%s517_s3 + $0x20] sm:$0xff]  ;;  %s369_s6 = scalar_lea.vmem %s279_s30, 256  ;;  %p374_p1 = scmp.lt.s32.totalorder %s279_s30, %s279_s30 }
   0x9   :  { %343 = vmatpush3.msra.mxu1 %v170_v10  ;;  %v166_v14 = vld [vmem:[%s517_s3 + $0x18] sm:$0xff]  ;;  %v165_v15 = vld [vmem:[%s517_s3 + $0x10] sm:$0xff]  ;;  %v164_v16 = vld [vmem:[%s517_s3 + $0x8] sm:$0xff]  ;;  %p370_p0 = scmp.ne.s32.totalorder %s279_s30, %s369_s6  ;;  %p375_p2 = scmp.lt.s32.totalorder %s369_s6, %s369_s6 }
   0xa   :  { %344 = vmatprep.subr.mxu1 %v169_v11  ;;  %v163_v17 = vld [vmem:[%s517_s3] sm:$0xff] }
   0xb   :  { %328 = vmatpush3.xpose.msk.msra.mxu0 %vm45_vm0, %v35_v3  ;;  %345 = vmatpush3.msra.mxu1 %v169_v11  ;;  %v289_v19 = vld [vmem:[%s516_s2] ss:$0 sm:$0xff]  ;;  %p376_p3 = por %p375_p2, %p374_p1 }
   0xc   :  { %329 = vmatprep.subr.msk.mxu0 %vm45_vm0, %v34_v4  ;;  %346 = vmatprep.subr.mxu1 %v168_v12  ;;  %v302_v40 = vld [vmem:[%s518_s4] ss:$0 sm:$0xff] }
   0xd   :  { %347 = vmatpush3.msra.mxu1 %v168_v12  ;;  %v162_v34 = vld [vmem:[#allocation2 + $0x8] sm:$0xff]  ;;  %p377_p4 = pnand %p376_p3, %p370_p0 }
   0xe   :  { %348 = vmatprep.subr.mxu1 %v167_v13  ;;  %v161_v36 = vld [vmem:[#allocation2] sm:$0xff] }
   0xf   :  { %330 = vmatpush3.xpose.msk.msra.mxu0 %vm45_vm0, %v34_v4  ;;  %349 = vmatpush3.msra.mxu1 %v167_v13 }
  0x10   :  { %331 = vmatprep.subr.msk.mxu0 %vm45_vm0, %v33_v5  ;;  %350 = vmatprep.subr.mxu1 %v166_v14 }
  0x11   :  { %351 = vmatpush3.msra.mxu1 %v166_v14 }
  0x12   :  { %352 = vmatprep.subr.mxu1 %v165_v15 }
  0x13   :  { %332 = vmatpush3.xpose.msk.msra.mxu0 %vm45_vm0, %v33_v5  ;;  %353 = vmatpush3.msra.mxu1 %v165_v15 }
  0x14   :  { %333 = vmatprep.subr.msk.mxu0 %vm45_vm0, %v32_v6  ;;  %354 = vmatprep.subr.mxu1 %v164_v16 }
  0x15   :  { %355 = vmatpush3.msra.mxu1 %v164_v16 }
  0x16   :  { %356 = vmatprep.subr.mxu1 %v163_v17 }
  0x17   :  { %334 = vmatpush3.xpose.msk.msra.mxu0 %vm45_vm0, %v32_v6  ;;  %357 = vmatpush3.msra.mxu1 %v163_v17 }
  0x18   :  { %335 = vmatprep.subr.msk.mxu0 %vm45_vm0, %v31_v7 }
  0x1b   :  { %336 = vmatpush3.xpose.msk.msra.mxu0 %vm45_vm0, %v31_v7 }
  0x1c   :  { %337 = vmatprep.subr.msk.mxu0 %vm45_vm0, %v30_v8 }
  0x1f   :  { %338 = vmatpush3.xpose.msk.msra.mxu0 %vm45_vm0, %v30_v8 }
  0x22   :  { %340 = vmatmul.mubr.msk.f32.vlgmr.msra.gmra.mxu0 %vm45_vm0, %v29_v9 }
  0xe2   :  { %v341_v20 = vpop.f32.mrf.mxu0 }
  0xe3   :  { %v148_v21 = vadd.f32 %v341_v20, %v289_v19 }
  0xe4   :  { %v142_v22 = vpop.f32.mrf.mxu0 }
  0xe5   :  { %v154_v23 = vmul.f32 0.70710677, %v148_v21  ;;  %v143_v24 = vadd.f32 %v289_v19, %v142_v22  ;;  %v152_v31 = vmul.f32 0.5, %v148_v21 }
  0xe7   :  { %365 = verf.f32 %v154_v23  ;;  %v153_v25 = vmul.f32 0.70710677, %v143_v24  ;;  %v151_v29 = vmul.f32 0.5, %v143_v24 }
  0xe9   :  { %367 = verf.f32 %v153_v25 }
  0xf4   :  { %v366_v26 = vpop.eup %365 }
  0xf5   :  { %v158_v28 = vadd.f32 1.0, %v366_v26 }
  0xf6   :  { %v368_v27 = vpop.eup %367 }
  0xf7   :  { %v157_v30 = vadd.f32 1.0, %v368_v27  ;;  %v160_v33 = vmul.f32 %v158_v28, %v152_v31 }
  0xf9   :  { %v159_v32 = vmul.f32 %v157_v30, %v151_v29 }
  0xfb   :  { %358 = vmatprep.mubr.msk.f32.mxu1 %vm25_vm1, %v159_v32 }
  0xfc   :  { %359 = vmatmul.mubr.msk.f32.vlgmr.msra.gmra.mxu1 %vm25_vm1, %v160_v33 }
 0x1bc   :  { %v360_v35 = vpop.f32.mrf.mxu1 }
 0x1bd   :  { %v254_v37 = vadd.f32 %v360_v35, %v162_v34 }
 0x1be   :  { %v244_v38 = vpop.f32.mrf.mxu1 }
 0x1bf   :  { %256 = vst.msk [vmem:[#allocation2 + $0x8] sm:$0xff] %vm25_vm1, %v254_v37  ;;  %v253_v39 = vadd.f32 %v244_v38, %v161_v36 }
 0x1c1   :  { %255 = vst.msk [vmem:[#allocation2] sm:$0xff] %vm25_vm1, %v253_v39 }
 0x1c6   :  { %v261_v41 = vld [vmem:[#allocation2 + $0x8] sm:$0xff] }
 0x1c7   :  { %v270_v42 = vadd.f32 %v302_v40, %v261_v41 }
 0x1c8   :  { %v260_v43 = vld [vmem:[#allocation2] sm:$0xff] }
 0x1c9   :  { %v269_v44 = vadd.f32 %v302_v40, %v260_v43  ;;  %272 = vst.msk [vmem:[#allocation3 + $0x8] sm:$0xff] %vm25_vm1, %v270_v42 }
 0x1cb   :  { %271 = vst.msk [vmem:[#allocation3] sm:$0xff] %vm25_vm1, %v269_v44 }
 0x1cc   :  { %380 = shalt.err (!%p377_p4)
}
 0x1cd   :  { %s393_s7 = smov 128   ;;  %s394_s4 = smov 8  }
 0x1ce   :  { %284 = dma.vmem_to_hbm [thread:$0]  %s279_s30, 256, %s519_s5, [#allocation4], %s393_s7, %s393_s7, %s394_s4  }
 0x1cf   :  { %389 = dma.done.wait [#allocation4], 256  }
 0x1d0   :  { %390 = vsyncadd [#allocation4], 4294967040 }
 0x1d1   :  { %288 = vsyncpa [#allocation4], 1 }

</bundles_post_ra>
